<compile_context>
chip_gen: v5e
topology: v5e:2x2
jax: 0.10.0
libtpu: 0.0.40
codegen_flags: <defaults>
</compile_context>

<pallas_src>
import functools

import jax
import jax.numpy as jnp
import numpy as np
from jax import lax
from jax.experimental import pallas as pl
from jax.experimental.pallas import tpu as pltpu

_LANE = 128   # f32 lane width
_TN = 128     # output-feature tile (MXU-friendly, VMEM-safe on v7x)


def _round_up(x, m):
    return (x + m - 1) // m * m


def _keep_mask(rows_i32, gcols_i32, seed_i32, c_out_total, thresh24):
    """Deterministic dropout keep-mask from an integer hash.

    rows/gcols: int32 arrays (same shape); seed_i32: scalar int32;
    keep probability = 1 - thresh24 / 2^24.  Pure 32-bit integer VPU ops, so
    it lowers identically inside the kernel (Mosaic) and outside (XLA).
    """
    lin = (rows_i32 * c_out_total + gcols_i32).astype(jnp.uint32)
    s = seed_i32.astype(jnp.uint32) * jnp.uint32(0x9E3779B9)
    h = lin ^ s
    h = (h ^ (h >> 16)) * jnp.uint32(0x7FEB352D)
    h = (h ^ (h >> 15)) * jnp.uint32(0x846CA68B)
    h = h ^ (h >> 16)
    r24 = (h >> 8).astype(jnp.int32)          # uniform in [0, 2^24)
    return r24 >= thresh24


def _perceptron_bn_end_kernel(seed_ref, x_ref, wt_ref, params_ref, o_ref, *,
                              p_drop, thresh24, eps, n_rows, c_out_total):
    j = pl.program_id(0)
    tn = o_ref.shape[1]

    params = params_ref[...]                  # (3, TN): bias / gamma / beta
    bias = params[0:1, :]
    gamma = params[1:2, :]
    beta = params[2:3, :]

    # ---- Linear: (N, C_in_p) @ (C_in_p, TN) + (1, TN); MXU, no transpose ----
    z = jnp.dot(x_ref[...], wt_ref[...],
                preferred_element_type=jnp.float32) + bias

    # ---- Dropout (train mode, inverted scaling), hash-based mask ----
    if p_drop > 0.0:
        rows = lax.broadcasted_iota(jnp.int32, z.shape, 0)
        cols = lax.broadcasted_iota(jnp.int32, z.shape, 1) + j * tn
        keep = _keep_mask(rows, cols, seed_ref[0], c_out_total, thresh24)
        z = jnp.where(keep, z * (1.0 / (1.0 - p_drop)), 0.0)

    # ---- ReLU ----
    h = jnp.maximum(z, 0.0)

    # ---- BatchNorm1d (training: single-pass batch stats, biased variance) ----
    inv_n = 1.0 / n_rows
    mean = jnp.sum(h, axis=0, keepdims=True) * inv_n
    ex2 = jnp.sum(h * h, axis=0, keepdims=True) * inv_n
    var = jnp.maximum(ex2 - mean * mean, 0.0)
    inv_std = lax.rsqrt(var + eps)
    o_ref[...] = ((h - mean) * (inv_std * gamma) + beta).astype(o_ref.dtype)


def perceptron_bn_end(x, w, b, gamma, beta, seed, *, p_drop=0.5, eps=1e-5,
                      tn=_TN):
    """x: (N, C_in) f32; w: (C_out, C_in); b/gamma/beta: (C_out,); seed: (1,) i32."""
    n, c_in = x.shape
    c_out = w.shape[0]
    c_in_p = _round_up(c_in, _LANE)
    c_out_p = _round_up(c_out, tn)

    xp = jnp.pad(x.astype(jnp.float32), ((0, 0), (0, c_in_p - c_in)))
    wt = jnp.pad(w.astype(jnp.float32),
                 ((0, c_out_p - c_out), (0, c_in_p - c_in))).T  # (C_in_p, C_out_p)

    # Fuse bias / gamma / beta into one (3, C_out_p) param slab -> 1 DMA/tile.
    params = jnp.stack([
        jnp.pad(b.astype(jnp.float32), (0, c_out_p - c_out)),
        jnp.pad(gamma.astype(jnp.float32), (0, c_out_p - c_out)),
        jnp.pad(beta.astype(jnp.float32), (0, c_out_p - c_out)),
    ], axis=0)

    thresh24 = min(int(round(float(p_drop) * (1 << 24))), (1 << 24) - 1)
    kernel = functools.partial(
        _perceptron_bn_end_kernel, p_drop=float(p_drop), thresh24=thresh24,
        eps=float(eps), n_rows=n, c_out_total=c_out_p)

    out = pl.pallas_call(
        kernel,
        out_shape=jax.ShapeDtypeStruct((n, c_out_p), jnp.float32),
        grid_spec=pltpu.PrefetchScalarGridSpec(
            num_scalar_prefetch=1,               # seed -> SMEM scalar
            grid=(c_out_p // tn,),
            in_specs=[
                pl.BlockSpec((n, c_in_p), lambda j, _s: (0, 0)),   # x (resident)
                pl.BlockSpec((c_in_p, tn), lambda j, _s: (0, j)),  # W.T tile
                pl.BlockSpec((3, tn), lambda j, _s: (0, j)),       # bias/gamma/beta
            ],
            out_specs=pl.BlockSpec((n, tn), lambda j, _s: (0, j)),
        ),
        compiler_params=pltpu.CompilerParams(
            dimension_semantics=("parallel",)),
    )(seed, xp, wt, params)
    return out[:, :c_out]


def _reference(x, w, b, gamma, beta, seed, *, p_drop, eps, c_out_pad):
    """Pure-JAX reference of the training-mode forward (same dropout mask)."""
    n, _ = x.shape
    c_out = w.shape[0]
    z = x @ w.T + jnp.reshape(b, (1, -1))
    if p_drop > 0.0:
        thresh24 = min(int(round(float(p_drop) * (1 << 24))), (1 << 24) - 1)
        rows = lax.broadcasted_iota(jnp.int32, (n, c_out_pad), 0)
        cols = lax.broadcasted_iota(jnp.int32, (n, c_out_pad), 1)
        keep = _keep_mask(rows, cols, seed[0], c_out_pad, thresh24)[:, :c_out]
        z = jnp.where(keep, z * (1.0 / (1.0 - p_drop)), 0.0)
    h = jnp.maximum(z, 0.0)
    mean = jnp.mean(h, axis=0, keepdims=True)
    var = jnp.mean((h - mean) ** 2, axis=0, keepdims=True)   # biased, like BN
    return ((h - mean) * lax.rsqrt(var + eps) * jnp.reshape(gamma, (1, -1))
            + jnp.reshape(beta, (1, -1)))


if __name__ == "__main__":
    # Small shapes consistent with the module: batch=8, c_in=32, c_out=64.
    N, C_IN, C_OUT = 8, 32, 64
    P_DROP = 0.5

    key = jax.random.PRNGKey(0)
    kx, kw, kb, kg, kbeta = jax.random.split(key, 5)

    x = jax.random.normal(kx, (N, C_IN), dtype=jnp.float32)
    # nn.Linear default init: U(-1/sqrt(c_in), 1/sqrt(c_in))
    bound = 1.0 / np.sqrt(C_IN)
    w = jax.random.uniform(kw, (C_OUT, C_IN), jnp.float32, -bound, bound)
    b = jax.random.uniform(kb, (C_OUT,), jnp.float32, -bound, bound)
    # BatchNorm1d affine params (torch init is gamma=1, beta=0; randomized
    # deterministically so the affine step is exercised non-trivially).
    gamma = 1.0 + 0.1 * jax.random.normal(kg, (C_OUT,), dtype=jnp.float32)
    beta = 0.1 * jax.random.normal(kbeta, (C_OUT,), dtype=jnp.float32)
    seed = jnp.array([1234], dtype=jnp.int32)

    out = perceptron_bn_end(x, w, b, gamma, beta, seed, p_drop=P_DROP)
    out = jax.block_until_ready(out)

    assert out.shape == (N, C_OUT)
    assert bool(jnp.all(jnp.isfinite(out)))

    ref = _reference(x, w, b, gamma, beta, seed, p_drop=P_DROP, eps=1e-5,
                     c_out_pad=_round_up(C_OUT, _TN))
    np.testing.assert_allclose(np.asarray(out), np.asarray(ref),
                               rtol=2e-3, atol=2e-3)
    # BN (train mode) guarantees per-feature batch mean of the output == beta.
    np.testing.assert_allclose(np.asarray(out.mean(axis=0)),
                               np.asarray(beta), atol=1e-3)

    print("KERNEL_OK")
</pallas_src>

<mosaic_0001>
module attributes {stable_mosaic.version = 11 : i64} {
  func.func @_perceptron_bn_end_kernel(%arg0: i32, %arg1: memref<1xi32, #tpu.memory_space<smem>>, %arg2: memref<8x128xf32, #tpu.memory_space<vmem>>, %arg3: memref<128x128xf32, #tpu.memory_space<vmem>>, %arg4: memref<3x128xf32, #tpu.memory_space<vmem>>, %arg5: memref<8x128xf32, #tpu.memory_space<vmem>>) attributes {dimension_semantics = [#tpu.dimension_semantics<parallel>], iteration_bounds = array<i64: 1>, scalar_prefetch = 1 : i64, scratch_operands = 0 : i64, tpu.core_type = #tpu.core_type<tc>, window_params = [{pipeline_mode = #tpu.pipeline_mode<synchronous>, transform_indices = @transform_0, window_bounds = array<i64: 8, 128>}, {transform_indices = @transform_1, window_bounds = array<i64: 128, 128>}, {transform_indices = @transform_2, window_bounds = array<i64: 3, 128>}, {transform_indices = @transform_3, window_bounds = array<i64: 8, 128>}]} {
    %c0 = arith.constant 0 : index
    %c0_0 = arith.constant 0 : index
    %0 = vector.load %arg4[%c0, %c0_0] : memref<3x128xf32, #tpu.memory_space<vmem>>, vector<3x128xf32>
    %1 = vector.extract_strided_slice %0 {offsets = [0, 0], sizes = [1, 128], strides = [1, 1]} : vector<3x128xf32> to vector<1x128xf32>
    %2 = vector.extract_strided_slice %0 {offsets = [1, 0], sizes = [1, 128], strides = [1, 1]} : vector<3x128xf32> to vector<1x128xf32>
    %3 = vector.extract_strided_slice %0 {offsets = [2, 0], sizes = [1, 128], strides = [1, 1]} : vector<3x128xf32> to vector<1x128xf32>
    %c0_1 = arith.constant 0 : index
    %c0_2 = arith.constant 0 : index
    %4 = vector.load %arg2[%c0_1, %c0_2] : memref<8x128xf32, #tpu.memory_space<vmem>>, vector<8x128xf32>
    %c0_3 = arith.constant 0 : index
    %c0_4 = arith.constant 0 : index
    %5 = vector.load %arg3[%c0_3, %c0_4] : memref<128x128xf32, #tpu.memory_space<vmem>>, vector<128x128xf32>
    %cst = arith.constant dense<0.000000e+00> : vector<8x128xf32>
    %6 = tpu.matmul %4, %5, %cst {dimension_numbers = #tpu.dot_dimension_numbers<[1], [0], [0], [1], [0, 0, 1, 1], [], []>} : vector<8x128xf32>, vector<128x128xf32>, vector<8x128xf32> -> vector<8x128xf32>
    %7 = vector.broadcast %1 : vector<1x128xf32> to vector<8x128xf32>
    %8 = arith.addf %6, %7 : vector<8x128xf32>
    %9 = tpu.iota {dimensions = array<i32: 0>} : vector<8x128xi32>
    %10 = tpu.iota {dimensions = array<i32: 1>} : vector<8x128xi32>
    %c128_i32 = arith.constant 128 : i32
    %11 = arith.muli %arg0, %c128_i32 : i32
    %12 = vector.broadcast %11 : i32 to vector<8x128xi32>
    %13 = arith.addi %10, %12 : vector<8x128xi32>
    %c0_5 = arith.constant 0 : index
    %14 = memref.load %arg1[%c0_5] : memref<1xi32, #tpu.memory_space<smem>>
    %c128_i32_6 = arith.constant 128 : i32
    %15 = vector.broadcast %c128_i32_6 : i32 to vector<8x128xi32>
    %16 = arith.muli %9, %15 : vector<8x128xi32>
    %17 = arith.addi %16, %13 : vector<8x128xi32>
    %c-1640531527_i32 = arith.constant -1640531527 : i32
    %18 = arith.muli %14, %c-1640531527_i32 : i32
    %19 = vector.broadcast %18 : i32 to vector<8x128xi32>
    %20 = arith.xori %17, %19 : vector<8x128xi32>
    %c16_i32 = arith.constant 16 : i32
    %21 = vector.broadcast %c16_i32 : i32 to vector<8x128xi32>
    %22 = arith.shrui %20, %21 : vector<8x128xi32>
    %23 = arith.xori %20, %22 : vector<8x128xi32>
    %c2146121005_i32 = arith.constant 2146121005 : i32
    %24 = vector.broadcast %c2146121005_i32 : i32 to vector<8x128xi32>
    %25 = arith.muli %23, %24 : vector<8x128xi32>
    %c15_i32 = arith.constant 15 : i32
    %26 = vector.broadcast %c15_i32 : i32 to vector<8x128xi32>
    %27 = arith.shrui %25, %26 : vector<8x128xi32>
    %28 = arith.xori %25, %27 : vector<8x128xi32>
    %c-2073254261_i32 = arith.constant -2073254261 : i32
    %29 = vector.broadcast %c-2073254261_i32 : i32 to vector<8x128xi32>
    %30 = arith.muli %28, %29 : vector<8x128xi32>
    %c16_i32_7 = arith.constant 16 : i32
    %31 = vector.broadcast %c16_i32_7 : i32 to vector<8x128xi32>
    %32 = arith.shrui %30, %31 : vector<8x128xi32>
    %33 = arith.xori %30, %32 : vector<8x128xi32>
    %c8_i32 = arith.constant 8 : i32
    %34 = vector.broadcast %c8_i32 : i32 to vector<8x128xi32>
    %35 = arith.shrui %33, %34 : vector<8x128xi32>
    %c8388608_i32 = arith.constant 8388608 : i32
    %36 = vector.broadcast %c8388608_i32 : i32 to vector<8x128xi32>
    %37 = arith.cmpi sge, %35, %36 : vector<8x128xi32>
    %cst_8 = arith.constant 2.000000e+00 : f32
    %38 = vector.broadcast %cst_8 : f32 to vector<8x128xf32>
    %39 = arith.mulf %8, %38 : vector<8x128xf32>
    %cst_9 = arith.constant 0.000000e+00 : f32
    %40 = vector.broadcast %cst_9 : f32 to vector<8x128xf32>
    %41 = arith.select %37, %39, %40 : vector<8x128xi1>, vector<8x128xf32>
    %cst_10 = arith.constant 0.000000e+00 : f32
    %42 = vector.broadcast %cst_10 : f32 to vector<8x128xf32>
    %43 = arith.maximumf %41, %42 : vector<8x128xf32>
    %cst_11 = arith.constant dense<0.000000e+00> : vector<128xf32>
    %44 = vector.multi_reduction <add>, %43, %cst_11 [0] : vector<8x128xf32> to vector<128xf32>
    %45 = vector.shape_cast %44 : vector<128xf32> to vector<1x128xf32>
    %cst_12 = arith.constant 1.250000e-01 : f32
    %46 = vector.broadcast %cst_12 : f32 to vector<1x128xf32>
    %47 = arith.mulf %45, %46 : vector<1x128xf32>
    %48 = arith.mulf %43, %43 : vector<8x128xf32>
    %cst_13 = arith.constant dense<0.000000e+00> : vector<128xf32>
    %49 = vector.multi_reduction <add>, %48, %cst_13 [0] : vector<8x128xf32> to vector<128xf32>
    %50 = vector.shape_cast %49 : vector<128xf32> to vector<1x128xf32>
    %cst_14 = arith.constant 1.250000e-01 : f32
    %51 = vector.broadcast %cst_14 : f32 to vector<1x128xf32>
    %52 = arith.mulf %50, %51 : vector<1x128xf32>
    %53 = arith.mulf %47, %47 : vector<1x128xf32>
    %54 = arith.subf %52, %53 : vector<1x128xf32>
    %cst_15 = arith.constant 0.000000e+00 : f32
    %55 = vector.broadcast %cst_15 : f32 to vector<1x128xf32>
    %56 = arith.maximumf %54, %55 : vector<1x128xf32>
    %cst_16 = arith.constant 9.99999974E-6 : f32
    %57 = vector.broadcast %cst_16 : f32 to vector<1x128xf32>
    %58 = arith.addf %56, %57 : vector<1x128xf32>
    %59 = math.rsqrt %58 : vector<1x128xf32>
    %60 = vector.broadcast %47 : vector<1x128xf32> to vector<8x128xf32>
    %61 = arith.subf %43, %60 : vector<8x128xf32>
    %62 = arith.mulf %59, %2 : vector<1x128xf32>
    %63 = vector.broadcast %62 : vector<1x128xf32> to vector<8x128xf32>
    %64 = arith.mulf %61, %63 : vector<8x128xf32>
    %65 = vector.broadcast %3 : vector<1x128xf32> to vector<8x128xf32>
    %66 = arith.addf %64, %65 : vector<8x128xf32>
    %c0_17 = arith.constant 0 : index
    %c0_18 = arith.constant 0 : index
    %67 = vector.load %arg5[%c0_17, %c0_18] : memref<8x128xf32, #tpu.memory_space<vmem>>, vector<8x128xf32>
    tpu.vector_store %arg5[%c0_17, %c0_18], %66 {strides = array<i32>} : memref<8x128xf32, #tpu.memory_space<vmem>>, vector<8x128xf32>,
    return
  }
  func.func @transform_0(%arg0: i32, %arg1: memref<1xi32, #tpu.memory_space<smem>>) -> (i32, i32) {
    %c0_i32 = arith.constant 0 : i32
    %c0_i32_0 = arith.constant 0 : i32
    %c0_i32_1 = arith.constant 0 : i32
    return %c0_i32, %c0_i32_0 : i32, i32
  }
  func.func @transform_1(%arg0: i32, %arg1: memref<1xi32, #tpu.memory_space<smem>>) -> (i32, i32) {
    %c0_i32 = arith.constant 0 : i32
    %c0_i32_0 = arith.constant 0 : i32
    return %c0_i32, %arg0 : i32, i32
  }
  func.func @transform_2(%arg0: i32, %arg1: memref<1xi32, #tpu.memory_space<smem>>) -> (i32, i32) {
    %c0_i32 = arith.constant 0 : i32
    %c0_i32_0 = arith.constant 0 : i32
    return %c0_i32, %arg0 : i32, i32
  }
  func.func @transform_3(%arg0: i32, %arg1: memref<1xi32, #tpu.memory_space<smem>>) -> (i32, i32) {
    %c0_i32 = arith.constant 0 : i32
    %c0_i32_0 = arith.constant 0 : i32
    return %c0_i32, %arg0 : i32, i32
  }
}

</mosaic_0001>

<bundles_post_ra>
// kernel: tpu_custom_call.1
= control target key start
LH: loop header
LB: loop body
LE: loop exit
PB: predicated region body
PF: predicated region fallthrough
CT: control target
= control target key end

     0   :  { %10 = vsyncpa [#allocation5], 0  ;;  %s335_s0 = inlined_call_operand.<no memory space> [shape: s32[1], index: 0, kind: input, shape index: {}]   ;;  %s336_s1 = inlined_call_operand.hbm [shape: f32[8,128], index: 1, kind: input, shape index: {}]   ;;  %s337_s2 = inlined_call_operand.hbm [shape: f32[128,128], index: 2, kind: input, shape index: {}]   ;;  %s338_s3 = inlined_call_operand.hbm [shape: f32[3,128], index: 3, kind: input, shape index: {}]   ;;  %s339_s4 = inlined_call_operand.hbm [shape: f32[8,128], index: 4, kind: output, shape index: {}]  }
   0x1   :  { %11 = vsyncpa [#allocation8], 0  ;;  %s28_s17 = sshll.u32 %s337_s2, 4  ;;  %s29_s17 = int_to_ptr.hbm [resolvable:$true] %s28_s17 }
   0x2   :  { %12 = vsyncpa [#allocation6], 0  ;;  %s289_s18 = smov [#allocation7]   ;;  %s18_s22 = sshll.u32 %s336_s1, 4  ;;  %s19_s22 = int_to_ptr.hbm [resolvable:$true] %s18_s22 }
   0x3   :  { %s30_s19 = sshll.u32 %s289_s18, 4  ;;  %s290_s23 = smov 128   ;;  %s31_s19 = int_to_ptr.vmem [resolvable:$true] %s30_s19 }
   0x4   :  { %s291_s24 = smov 8   ;;  %s292_s25 = smov [#allocation4]  }
   0x5   :  { %36 = dma.hbm_to_vmem [thread:$0]  %s29_s17, 2048, %s31_s19, [#allocation8], %s290_s23, %s290_s23, %s291_s24  }
   0x6   :  { %s20_s26 = sshll.u32 %s292_s25, 4  ;;  %s42_s29 = sshll.u32 %s338_s3, 4  ;;  %s21_s26 = int_to_ptr.vmem [resolvable:$true] %s20_s26  ;;  %s43_s29 = int_to_ptr.hbm [resolvable:$true] %s42_s29 }
   0x7   :  { %23 = dma.hbm_to_vmem [thread:$0]  %s19_s22, 128, %s21_s26, [#allocation5]  }
   0x8   :  { %s293_s2 = smov [#allocation9]  }
   0x9   :  { %s44_s30 = sshll.u32 %s293_s2, 4  ;;  %s45_s30 = int_to_ptr.vmem [resolvable:$true] %s44_s30 }
   0xa   :  { %47 = dma.hbm_to_vmem [thread:$0]  %s43_s29, 64, %s45_s30, [#allocation8]  }
   0xb   :  { %283 = dma.done.wait [#allocation5], 128  }
   0xc   :  { %284 = vsyncadd [#allocation5], 4294967168 }
   0xd   :  { %285 = dma.done.wait [#allocation8], 2112  }
   0xe   :  { %286 = vsyncadd [#allocation8], 4294965184  ;;  %v77_v0 = vld [vmem:[#allocation7 + $0x78] sm:$0xff]  ;;  %v76_v1 = vld [vmem:[#allocation7 + $0x70] sm:$0xff]  ;;  %v99_v17 = vlaneseq  ;;  %s109_s5 = smul.u32 2654435769, %s335_s0 }
   0xf   :  { %79 = vmatpush.msra.mxu0 %v77_v0  ;;  %v75_v2 = vld [vmem:[#allocation7 + $0x68] sm:$0xff]  ;;  %v74_v3 = vld [vmem:[#allocation7 + $0x60] sm:$0xff]  ;;  %v73_v4 = vld [vmem:[#allocation7 + $0x58] sm:$0xff]  ;;  %s294_s0 = smov [#allocation10]   ;;  %s168_s9 = sshll.u32 %s339_s4, 4  ;;  %s169_s9 = int_to_ptr.hbm [resolvable:$true] %s168_s9 }
  0x10   :  { %v72_v5 = vld [vmem:[#allocation7 + $0x50] sm:$0xff]  ;;  %v71_v6 = vld [vmem:[#allocation7 + $0x48] sm:$0xff]  ;;  %v70_v7 = vld [vmem:[#allocation7 + $0x40] sm:$0xff]  ;;  %v100_v18 = vshrl.u32 %v99_v17, 7  ;;  %v102_v19 = vand.u32 127, %v99_v17  ;;  %v110_v22 = vstv %s109_s5  ;;  %s166_s6 = sshll.u32 %s294_s0, 4  ;;  %s167_s6 = int_to_ptr.vmem [resolvable:$true] %s166_s6 }
  0x11   :  { %80 = vmatpush.msra.mxu0 %v76_v1  ;;  %v69_v8 = vld [vmem:[#allocation7 + $0x38] sm:$0xff]  ;;  %v68_v9 = vld [vmem:[#allocation7 + $0x30] sm:$0xff]  ;;  %v67_v10 = vld [vmem:[#allocation7 + $0x28] sm:$0xff] }
  0x12   :  { %v66_v11 = vld [vmem:[#allocation7 + $0x20] sm:$0xff]  ;;  %v65_v12 = vld [vmem:[#allocation7 + $0x18] sm:$0xff]  ;;  %v64_v13 = vld [vmem:[#allocation7 + $0x10] sm:$0xff]  ;;  %v107_v20 = vmul.u32 128, %v100_v18 }
  0x13   :  { %81 = vmatpush.msra.mxu0 %v75_v2  ;;  %v63_v14 = vld [vmem:[#allocation7 + $0x8] sm:$0xff]  ;;  %v62_v15 = vld [vmem:[#allocation7] sm:$0xff]  ;;  %v61_v16 = vld [vmem:[#allocation4] sm:$0xff] }
  0x14   :  { %v108_v21 = vadd.s32 %v107_v20, %v102_v19  ;;  %v60_v31 = vld [vmem:[#allocation9] sm:$0x7] }
  0x15   :  { %82 = vmatpush.msra.mxu0 %v74_v3  ;;  %v78_v33 = vperm.slane %v60_v31, 0 }
  0x16   :  { %v111_v23 = vxor.u32 %v110_v22, %v108_v21 }
  0x17   :  { %83 = vmatpush.msra.mxu0 %v73_v4  ;;  %v158_v4 = vperm.slane %v60_v31, 2 }
  0x18   :  { %v112_v24 = vshrl.u32 %v111_v23, 16 }
  0x19   :  { %84 = vmatpush.msra.mxu0 %v72_v5 }
  0x1a   :  { %v113_v25 = vxor.u32 %v112_v24, %v111_v23 }
  0x1b   :  { %85 = vmatpush.msra.mxu0 %v71_v6 }
  0x1c   :  { %v114_v26 = vmul.u32 2146121005, %v113_v25 }
  0x1d   :  { %86 = vmatpush.msra.mxu0 %v70_v7 }
  0x1e   :  { %v115_v27 = vshrl.u32 %v114_v26, 15 }
  0x1f   :  { %87 = vmatpush.msra.mxu0 %v69_v8 }
  0x20   :  { %v116_v28 = vxor.u32 %v115_v27, %v114_v26 }
  0x21   :  { %88 = vmatpush.msra.mxu0 %v68_v9 }
  0x22   :  { %v117_v29 = vmul.u32 2221713035, %v116_v28 }
  0x23   :  { %89 = vmatpush.msra.mxu0 %v67_v10 }
  0x24   :  { %v118_v30 = vshrl.u32 %v117_v29, 16 }
  0x25   :  { %90 = vmatpush.msra.mxu0 %v66_v11 }
  0x26   :  { %v119_v32 = vxor.u32 %v118_v30, %v117_v29 }
  0x27   :  { %91 = vmatpush.msra.mxu0 %v65_v12 }
  0x28   :  { %v120_v34 = vshrl.u32 %v119_v32, 8 }
  0x29   :  { %92 = vmatpush.msra.mxu0 %v64_v13 }
  0x2a   :  { %vm121_vm0 = vcmp.ge.s32.totalorder %v120_v34, 8388608 }
  0x2b   :  { %93 = vmatpush.msra.mxu0 %v63_v14 }
  0x2d   :  { %94 = vmatpush.msra.mxu0 %v62_v15 }
  0x2e   :  { %95 = vmatmul.f32.vlgmr.msra.gmra.mxu0 %v61_v16 }
  0xab   :  { %v96_v35 = vpop.f32.mrf.mxu0 }
  0xac   :  { %v97_v36 = vadd.f32 %v96_v35, %v78_v33 }
  0xae   :  { %v122_v37 = vmul.f32 2.0, %v97_v36 }
  0xb0   :  { %v123_v38 = vsel %vm121_vm0, %v122_v37, 0.0 }
  0xb1   :  { %v124_v39 = vmax.f32 %v123_v38, 0.0 }
  0xb3   :  { %v125_v40 = vrot.slane %v124_v39, 4  ;;  %v132_v41 = vmul.f32 %v124_v39, %v124_v39 }
  0xb5   :  { %v126_v42 = vadd.f32 %v125_v40, %v124_v39  ;;  %v133_v43 = vrot.slane %v132_v41, 4 }
  0xb7   :  { %v127_v44 = vrot.slane %v126_v42, 2  ;;  %v134_v45 = vadd.f32 %v133_v43, %v132_v41 }
  0xb9   :  { %v128_v46 = vadd.f32 %v127_v44, %v126_v42  ;;  %v135_v47 = vrot.slane %v134_v45, 2 }
  0xbb   :  { %v129_v48 = vrot.slane %v128_v46, 1  ;;  %v136_v49 = vadd.f32 %v135_v47, %v134_v45 }
  0xbd   :  { %v130_v50 = vadd.f32 %v129_v48, %v128_v46  ;;  %v137_v51 = vrot.slane %v136_v49, 1 }
  0xbf   :  { %v131_v52 = vmul.f32 0.125, %v130_v50  ;;  %v138_v53 = vadd.f32 %v137_v51, %v136_v49 }
  0xc1   :  { %v139_v54 = vmul.f32 0.125, %v138_v53  ;;  %v140_v55 = vmul.f32 %v131_v52, %v131_v52  ;;  %v154_v5 = vsub.f32 %v124_v39, %v131_v52 }
  0xc3   :  { %v141_v56 = vsub.f32 %v139_v54, %v140_v55 }
  0xc5   :  { %v142_v57 = vmax.f32 %v141_v56, 0.0 }
  0xc7   :  { %v143_v58 = vadd.f32 1e-05, %v142_v57 }
  0xc9   :  { %185 = vrsqrt.f32 %v143_v58  ;;  %vm150_vm2 = vweird.f32 %v143_v58 }
  0xcf   :  { %v186_v59 = vpop.eup %185 }
  0xd0   :  { %v145_v60 = vmul.f32 %v186_v59, %v143_v58  ;;  %vm151_vm1 = vweird.f32 %v186_v59 }
  0xd1   :  { %vm152_vm3 = vmor %vm150_vm2, %vm151_vm1 }
  0xd2   :  { %v146_v61 = vmul.f32 %v186_v59, %v145_v60 }
  0xd4   :  { %v147_v62 = vmul.f32 0.5, %v146_v61 }
  0xd6   :  { %v148_v63 = vsub.f32 1.5, %v147_v62 }
  0xd8   :  { %v149_v0 = vmul.f32 %v186_v59, %v148_v63 }
  0xda   :  { %v153_v1 = vsel %vm152_vm3, %v186_v59, %v149_v0 }
  0xdb   :  { %v155_v2 = vmul.f32 %v153_v1, %v60_v31 }
  0xdd   :  { %v156_v3 = vperm.slane %v155_v2, 1 }
  0xdf   :  { %v157_v6 = vmul.f32 %v156_v3, %v154_v5 }
  0xe1   :  { %v159_v7 = vadd.f32 %v158_v4, %v157_v6 }
  0xe3   :  { %160 = vst [vmem:[#allocation10] sm:$0xff] %v159_v7 }
  0xe4   :  { %171 = dma.vmem_to_hbm [thread:$0]  %s167_s6, 128, %s169_s9, [#allocation6]  }
  0xe5   :  { %287 = dma.done.wait [#allocation6], 128  }
  0xe6   :  { %288 = vsyncadd [#allocation6], 4294967168 }
  0xe7   :  { %176 = vsyncpa [#allocation5], 1 }
  0xe8   :  { %177 = vsyncpa [#allocation8], 1 }
  0xe9   :  { %178 = vsyncpa [#allocation6], 1 }

</bundles_post_ra>
